<compile_context>
chip_gen: v5e
topology: v5e:2x2
jax: 0.10.0
libtpu: 0.0.40
codegen_flags: <defaults>
</compile_context>

<pallas_src>
import functools

import jax
import jax.numpy as jnp
from jax.experimental import pallas as pl
from jax.experimental.pallas import tpu as pltpu


LOG_STD_MIN = -5.0
LOG_STD_MAX = 2.0

_LANES = 128


def _sublane_multiple(dtype):
    """Minimum sublane tile: 8 for 4-byte, 16 for 2-byte, 32 for 1-byte dtypes."""
    itemsize = jnp.dtype(dtype).itemsize
    return max(8, 32 // max(1, itemsize))


def _pick_tile_rows(rows, sub, target=1024):
    """Largest practical row tile (multiple of `sub`), keeping >=4 grid steps
    when the array is big enough so v7x can shard across both TensorCores."""
    t = min(target, rows)
    t = max(sub, (t // sub) * sub)
    while rows > 4 * sub and pl.cdiv(rows, t) < 4 and t > sub:
        t = max(sub, ((t // 2) // sub) * sub)
    return t


def _actor_kernel(x_ref, std_ref, mean_ref):
    """Elementwise hot path: tanh -> affine rescale -> exp.

    `loc` is intentionally not emitted (identity of the input); the wrapper
    returns the input array directly.
    """
    x = x_ref[...].astype(jnp.float32)
    t = jnp.tanh(x)
    log_std = LOG_STD_MIN + 0.5 * (LOG_STD_MAX - LOG_STD_MIN) * (t + 1.0)
    std_ref[...] = jnp.exp(log_std).astype(std_ref.dtype)
    mean_ref[...] = t.astype(mean_ref.dtype)


@jax.jit
def diag_gaussian_actor_forward(mu):
    """Returns (loc, std, squashed_mean), each with mu's shape/dtype.

    These are the SquashedNormal(loc, std) parameters plus its deterministic
    mean (tanh(loc)); the distribution object itself cannot cross the kernel
    boundary.
    """
    orig_shape = mu.shape
    n = 1
    for s in orig_shape:
        n *= s

    sub = _sublane_multiple(mu.dtype)
    chunk = sub * _LANES                       # minimum lane-dense slab granule
    n_pad = ((n + chunk - 1) // chunk) * chunk  # <= chunk-1 elems of padding

    flat = mu.reshape(n)
    if n_pad != n:
        flat = jnp.pad(flat, (0, n_pad - n))
    rows = n_pad // _LANES
    x2d = flat.reshape(rows, _LANES)            # lane-dense: unmasked vst

    tile_rows = _pick_tile_rows(rows, sub)
    grid = (pl.cdiv(rows, tile_rows),)
    spec = pl.BlockSpec((tile_rows, _LANES), lambda i: (i, 0))

    out_sds = jax.ShapeDtypeStruct((rows, _LANES), mu.dtype)
    std2d, mean2d = pl.pallas_call(
        _actor_kernel,
        out_shape=(out_sds, out_sds),
        grid=grid,
        in_specs=[spec],
        out_specs=(spec, spec),
        compiler_params=pltpu.CompilerParams(
            dimension_semantics=("parallel",)
        ),
    )(x2d)

    def unflatten(y2d):
        y = y2d.reshape(n_pad)
        if n_pad != n:
            y = y[:n]
        return y.reshape(orig_shape)

    # loc == mu (no kernel write / no extra copy).
    return mu, unflatten(std2d), unflatten(mean2d)


def init_params(hidden_dim=1280, act_dim=18, key=jax.random.PRNGKey(0)):
    """Deterministic init of the module's Linear params (orthogonal W, zero b).

    NOTE: these parameters exist in DiagGaussianActor.__init__ but are NOT
    used by its forward pass (verbatim PyTorch behavior), so the kernel does
    not consume them. They are built here only to mirror the module state.
    """
    k_mu, k_ls = jax.random.split(key)
    ortho = jax.nn.initializers.orthogonal()
    params = {
        "mu": {
            "weight": ortho(k_mu, (act_dim, hidden_dim), jnp.float32),
            "bias": jnp.zeros((act_dim,), jnp.float32),
        },
        "log_std": {
            "weight": ortho(k_ls, (act_dim, hidden_dim), jnp.float32),
            "bias": jnp.zeros((act_dim,), jnp.float32),
        },
    }
    return params


def _reference_forward(mu):
    t = jnp.tanh(mu.astype(jnp.float32))
    log_std = LOG_STD_MIN + 0.5 * (LOG_STD_MAX - LOG_STD_MIN) * (t + 1.0)
    std = jnp.exp(log_std)
    return mu, std.astype(mu.dtype), t.astype(mu.dtype)


if __name__ == "__main__":
    key = jax.random.PRNGKey(0)

    # Module parameters (unused in forward, mirrored for completeness).
    _params = init_params(hidden_dim=32, act_dim=18, key=key)

    # Small example input matching the module docstring layout
    # (batch=2, seq=8, act_dim=18) — exercises the lane-dense flatten + pad path.
    B, T, D = 2, 8, 18
    mu = jax.random.normal(jax.random.fold_in(key, 1), (B, T, D), jnp.float32)

    loc, std, mean = diag_gaussian_actor_forward(mu)
    jax.block_until_ready((loc, std, mean))

    ref_loc, ref_std, ref_mean = _reference_forward(mu)
    assert loc.shape == mu.shape and std.shape == mu.shape and mean.shape == mu.shape
    assert jnp.allclose(loc, ref_loc, atol=1e-6, rtol=1e-6)
    assert jnp.allclose(std, ref_std, atol=1e-5, rtol=1e-5)
    assert jnp.allclose(mean, ref_mean, atol=1e-6, rtol=1e-6)

    # Also exercise a lane-aligned shape that skips padding entirely.
    mu2 = jax.random.normal(jax.random.fold_in(key, 2), (2, 8, 128), jnp.float32)
    loc2, std2, mean2 = diag_gaussian_actor_forward(mu2)
    jax.block_until_ready((loc2, std2, mean2))
    r_loc2, r_std2, r_mean2 = _reference_forward(mu2)
    assert jnp.allclose(loc2, r_loc2, atol=1e-6, rtol=1e-6)
    assert jnp.allclose(std2, r_std2, atol=1e-5, rtol=1e-5)
    assert jnp.allclose(mean2, r_mean2, atol=1e-6, rtol=1e-6)

    # TODO(synk): SquashedNormal's stochastic methods (rsample/log_prob/entropy)
    # are distribution-object APIs, not part of the forward hot path; only the
    # distribution parameters (loc, std) and deterministic mean are kernelized.
    print("KERNEL_OK")
</pallas_src>

<mosaic_0001>
module attributes {stable_mosaic.version = 11 : i64} {
  func.func @_actor_kernel(%arg0: i32, %arg1: memref<8x128xf32, #tpu.memory_space<vmem>>, %arg2: memref<8x128xf32, #tpu.memory_space<vmem>>, %arg3: memref<8x128xf32, #tpu.memory_space<vmem>>) attributes {dimension_semantics = [#tpu.dimension_semantics<parallel>], iteration_bounds = array<i64: 1>, scalar_prefetch = 0 : i64, scratch_operands = 0 : i64, tpu.core_type = #tpu.core_type<tc>, window_params = [{transform_indices = @transform_0, window_bounds = array<i64: 8, 128>}, {transform_indices = @transform_1, window_bounds = array<i64: 8, 128>}, {transform_indices = @transform_2, window_bounds = array<i64: 8, 128>}]} {
    %c0 = arith.constant 0 : index
    %c0_0 = arith.constant 0 : index
    %0 = vector.load %arg1[%c0, %c0_0] : memref<8x128xf32, #tpu.memory_space<vmem>>, vector<8x128xf32>
    %1 = math.tanh %0 : vector<8x128xf32>
    %cst = arith.constant 1.000000e+00 : f32
    %2 = vector.broadcast %cst : f32 to vector<8x128xf32>
    %3 = arith.addf %1, %2 : vector<8x128xf32>
    %cst_1 = arith.constant 3.500000e+00 : f32
    %4 = vector.broadcast %cst_1 : f32 to vector<8x128xf32>
    %5 = arith.mulf %4, %3 : vector<8x128xf32>
    %cst_2 = arith.constant -5.000000e+00 : f32
    %6 = vector.broadcast %cst_2 : f32 to vector<8x128xf32>
    %7 = arith.addf %6, %5 : vector<8x128xf32>
    %8 = math.exp %7 : vector<8x128xf32>
    %c0_3 = arith.constant 0 : index
    %c0_4 = arith.constant 0 : index
    %9 = vector.load %arg2[%c0_3, %c0_4] : memref<8x128xf32, #tpu.memory_space<vmem>>, vector<8x128xf32>
    tpu.vector_store %arg2[%c0_3, %c0_4], %8 {strides = array<i32>} : memref<8x128xf32, #tpu.memory_space<vmem>>, vector<8x128xf32>,
    %c0_5 = arith.constant 0 : index
    %c0_6 = arith.constant 0 : index
    %10 = vector.load %arg3[%c0_5, %c0_6] : memref<8x128xf32, #tpu.memory_space<vmem>>, vector<8x128xf32>
    tpu.vector_store %arg3[%c0_5, %c0_6], %1 {strides = array<i32>} : memref<8x128xf32, #tpu.memory_space<vmem>>, vector<8x128xf32>,
    return
  }
  func.func @transform_0(%arg0: i32) -> (i32, i32) {
    %c0_i32 = arith.constant 0 : i32
    %c0_i32_0 = arith.constant 0 : i32
    return %arg0, %c0_i32 : i32, i32
  }
  func.func @transform_1(%arg0: i32) -> (i32, i32) {
    %c0_i32 = arith.constant 0 : i32
    %c0_i32_0 = arith.constant 0 : i32
    return %arg0, %c0_i32 : i32, i32
  }
  func.func @transform_2(%arg0: i32) -> (i32, i32) {
    %c0_i32 = arith.constant 0 : i32
    %c0_i32_0 = arith.constant 0 : i32
    return %arg0, %c0_i32 : i32, i32
  }
}

</mosaic_0001>

<bundles_post_ra>
// kernel: diag_gaussian_actor_forward.1
= control target key start
LH: loop header
LB: loop body
LE: loop exit
PB: predicated region body
PF: predicated region fallthrough
CT: control target
= control target key end

     0   :  { %s55_s0 = inlined_call_operand.vmem [shape: f32[8,128], index: 0, kind: input, shape index: {}]   ;;  %s56_s2 = inlined_call_operand.vmem [shape: f32[8,128], index: 2, kind: output, shape index: {1}]   ;;  %s57_s1 = inlined_call_operand.vmem [shape: f32[8,128], index: 1, kind: output, shape index: {0}]  }
   0x1   :  { %v10_v0 = vld [vmem:[%s55_s0] sm:$0xff] }
   0x2   :  { %27 = vtanh.f32 %v10_v0 }
   0x8   :  { %v28_v1 = vpop.eup %27 }
   0x9   :  { %v12_v2 = vadd.f32 1.0, %v28_v1  ;;  %18 = vst [vmem:[%s56_s2] sm:$0xff] %v28_v1 }
   0xb   :  { %v13_v3 = vmul.f32 3.5, %v12_v2 }
   0xd   :  { %v14_v4 = vadd.f32 -5.0, %v13_v3 }
   0xf   :  { %v15_v5 = vmul.f32 1.442695, %v14_v4 }
  0x11   :  { %29 = vpow2.f32 %v15_v5 }
  0x17   :  { %v30_v6 = vpop.eup %29 }
  0x18   :  { %17 = vst [vmem:[%s57_s1] sm:$0xff] %v30_v6 }

</bundles_post_ra>
